<compile_context>
chip_gen: v6e
topology: v6e:2x2x1
jax: 0.10.0
libtpu: 0.0.40
codegen_flags: <defaults>
</compile_context>

<pallas_src>
import numpy as np
import jax
import jax.numpy as jnp
from jax.experimental import pallas as pl
from jax.experimental.pallas import tpu as pltpu


_KRON_BYTES_LIMIT = 512 * 1024  # use fused kron(U_h, U_w) upsample below this size


def _bilinear_matrix(n_in: int, n_out: int) -> np.ndarray:
    """M (n_out, n_in) with M @ v == 1-D bilinear resize of v, align_corners=True
    (matches torch.nn.Upsample(mode='bilinear', align_corners=True) per axis)."""
    M = np.zeros((n_out, n_in), dtype=np.float32)
    if n_out == 1 or n_in == 1:
        M[:, 0] = 1.0
        return M
    scale = (n_in - 1) / (n_out - 1)
    for i in range(n_out):
        src = i * scale
        i0 = min(int(np.floor(src)), n_in - 1)
        i1 = min(i0 + 1, n_in - 1)
        f = src - i0
        M[i, i0] += 1.0 - f
        M[i, i1] += f
    return M


def _col_tile(total: int) -> int:
    """Lane-dense column tile (multiple of 128) that splits `total` into >=2 pieces
    (gives a second parallel grid axis so both TensorCores get work even at N=1);
    otherwise use the whole extent as a single tile."""
    for t in (1024, 512, 256, 128):
        if total % t == 0 and total // t >= 2:
            return t
    return total


# ------------------------------------------------------------------------ kernels
def _conv_sigmoid_kernel(w_ref, b_ref, x_ref, o_ref):
    """scale_factor == 1: 1x1 conv over channels on the MXU + sigmoid, lane-dense.
    x_ref: (C, Tcol) spatial-flattened tile, w_ref: (1, C), o_ref: (1, Tcol)."""
    y = jnp.dot(w_ref[...], x_ref[...], preferred_element_type=jnp.float32)
    o_ref[...] = jax.nn.sigmoid(y + b_ref[0]).astype(o_ref.dtype)


def _conv_upsample_flat_kernel(w_ref, b_ref, x_ref, u2t_ref, o_ref):
    """Fused path: channel reduction at low res, then one matmul with kron(U_h,U_w)^T.
    x_ref: (C, H*W), u2t_ref: (H*W, Tcol), o_ref: (1, Tcol). Lane-dense MXU work."""
    y = jnp.dot(w_ref[...], x_ref[...], preferred_element_type=jnp.float32)   # (1, H*W)
    up = jnp.dot(y, u2t_ref[...], preferred_element_type=jnp.float32)         # (1, Tcol)
    o_ref[...] = jax.nn.sigmoid(up + b_ref[0]).astype(o_ref.dtype)


def _channel_reduce_kernel(w_ref, x_ref, o_ref):
    """Separable path step 1: 1x1 conv (no bias/sigmoid) at low resolution on the MXU.
    x_ref: (C, Tcol), w_ref: (1, C), o_ref: (1, Tcol)."""
    o_ref[...] = jnp.dot(w_ref[...], x_ref[...],
                         preferred_element_type=jnp.float32).astype(o_ref.dtype)


def _upsample_sigmoid_kernel(b_ref, y_ref, uh_ref, uwt_ref, o_ref):
    """Separable path step 2: U_h @ y @ U_w^T (two MXU matmuls) + bias + sigmoid.
    y_ref: (H, W), uh_ref: (Ho, H), uwt_ref: (W, Wo), o_ref: (Ho, Wo)."""
    t = jnp.dot(uh_ref[...], y_ref[...], preferred_element_type=jnp.float32)   # (Ho, W)
    up = jnp.dot(t, uwt_ref[...], preferred_element_type=jnp.float32)          # (Ho, Wo)
    o_ref[...] = jax.nn.sigmoid(up + b_ref[0]).astype(o_ref.dtype)


# ----------------------------------------------------------------------- wrappers
def _ph_block_flat(x, weight, bias, u2t, out_hw):
    """Lane-dense flattened path (scale==1, or fused kron upsample for small maps)."""
    N, C, H, W = x.shape
    HW = H * W
    Ho, Wo = out_hw
    HoWo = Ho * Wo
    tcol = _col_tile(HoWo)

    xf = x.reshape(N, C, HW)          # wrapper-side reshape (free in XLA)
    w2 = weight.reshape(1, C)

    if u2t is None:
        kernel = _conv_sigmoid_kernel
        x_spec = pl.BlockSpec((None, C, tcol), lambda t, n: (n, 0, t))
        extra_specs, extra_args = [], []
    else:
        kernel = _conv_upsample_flat_kernel
        x_spec = pl.BlockSpec((None, C, HW), lambda t, n: (n, 0, 0))
        # Column tile of kron(U_h,U_w)^T: constant along the inner batch axis, so each
        # operator tile is DMA'd from HBM exactly once regardless of N.
        extra_specs = [pl.BlockSpec((HW, tcol), lambda t, n: (0, t))]
        extra_args = [u2t]

    out = pl.pallas_call(
        kernel,
        out_shape=jax.ShapeDtypeStruct((N, 1, HoWo), x.dtype),
        grid_spec=pltpu.PrefetchScalarGridSpec(
            num_scalar_prefetch=0,
            grid=(HoWo // tcol, N),                                  # (col tile, batch)
            in_specs=[
                pl.BlockSpec((1, C), lambda t, n: (0, 0)),               # weight (1,C)
                pl.BlockSpec(memory_space=pltpu.MemorySpace.SMEM),       # bias   (1,)
                x_spec,
            ] + extra_specs,
            out_specs=pl.BlockSpec((None, 1, tcol), lambda t, n: (n, 0, t)),
        ),
        compiler_params=pltpu.CompilerParams(
            dimension_semantics=("parallel", "parallel")),
    )(w2, bias, xf, *extra_args)
    return out.reshape(N, 1, Ho, Wo)


def _ph_block_separable(x, weight, bias, scale_factor):
    """Separable U_h @ y @ U_w^T path for spatial maps too large for the kron fusion.
    Two Pallas calls: MXU channel reduction at low res, then separable upsample."""
    N, C, H, W = x.shape
    HW = H * W
    Ho, Wo = H * scale_factor, W * scale_factor
    tcol = _col_tile(HW)

    xf = x.reshape(N, C, HW)
    w2 = weight.reshape(1, C)

    # Step 1: channel reduction at low resolution (lane-dense MXU matmul).
    y = pl.pallas_call(
        _channel_reduce_kernel,
        out_shape=jax.ShapeDtypeStruct((N, 1, HW), jnp.float32),
        grid_spec=pltpu.PrefetchScalarGridSpec(
            num_scalar_prefetch=0,
            grid=(HW // tcol, N),
            in_specs=[
                pl.BlockSpec((1, C), lambda t, n: (0, 0)),
                pl.BlockSpec((None, C, tcol), lambda t, n: (n, 0, t)),
            ],
            out_specs=pl.BlockSpec((None, 1, tcol), lambda t, n: (n, 0, t)),
        ),
        compiler_params=pltpu.CompilerParams(
            dimension_semantics=("parallel", "parallel")),
    )(w2, xf)
    y = y.reshape(N, 1, H, W)

    uh = jnp.asarray(_bilinear_matrix(H, Ho))        # (Ho, H)
    uwt = jnp.asarray(_bilinear_matrix(W, Wo).T)     # (W, Wo)

    # Step 2: separable bilinear upsample + bias + sigmoid, one image per grid step.
    return pl.pallas_call(
        _upsample_sigmoid_kernel,
        out_shape=jax.ShapeDtypeStruct((N, 1, Ho, Wo), x.dtype),
        grid_spec=pltpu.PrefetchScalarGridSpec(
            num_scalar_prefetch=0,
            grid=(N,),
            in_specs=[
                pl.BlockSpec(memory_space=pltpu.MemorySpace.SMEM),       # bias (1,)
                pl.BlockSpec((None, None, H, W), lambda n: (n, 0, 0, 0)),
                pl.BlockSpec((Ho, H), lambda n: (0, 0)),
                pl.BlockSpec((W, Wo), lambda n: (0, 0)),
            ],
            out_specs=pl.BlockSpec((None, None, Ho, Wo), lambda n: (n, 0, 0, 0)),
        ),
        compiler_params=pltpu.CompilerParams(dimension_semantics=("parallel",)),
    )(bias, y, uh, uwt)


def ph_block(x, weight, bias, scale_factor):
    """PH_Block.forward: [bilinear upsample] -> Conv2d(C,1,1) -> Sigmoid.
    x: (N,C,H,W) f32, weight: (C,) f32, bias: (1,) f32. Returns (N,1,H*s,W*s)."""
    _, _, H, W = x.shape
    s = int(scale_factor)
    if s <= 1:
        return _ph_block_flat(x, weight, bias, None, (H, W))
    Ho, Wo = H * s, W * s
    kron_bytes = (Ho * Wo) * (H * W) * 4
    if kron_bytes <= _KRON_BYTES_LIMIT:
        u2 = np.kron(_bilinear_matrix(H, Ho), _bilinear_matrix(W, Wo))   # (HoWo, HW)
        return _ph_block_flat(x, weight, bias, jnp.asarray(u2.T), (Ho, Wo))
    return _ph_block_separable(x, weight, bias, s)


def prediction_head(x_list, params, scale_factors):
    """PredictionHead.forward: reverse feature list, apply PH_Block i to x[::-1][i]."""
    xs = x_list[::-1]
    outs = []
    for i, (w, b) in enumerate(params):
        outs.append(ph_block(xs[i], w, b, scale_factors[i]))
    return outs


def _reference_block(x, weight, bias, scale_factor):
    """Pure-JAX reference (same math, no Pallas): upsample -> 1x1 conv -> sigmoid."""
    N, C, H, W = x.shape
    Ho, Wo = H * scale_factor, W * scale_factor
    uh = jnp.asarray(_bilinear_matrix(H, Ho))
    uw = jnp.asarray(_bilinear_matrix(W, Wo))
    up = jnp.einsum('oh,nchw,pw->ncop', uh, x, uw)
    y = jnp.einsum('c,ncop->nop', weight, up)[:, None, :, :] + bias[0]
    return jax.nn.sigmoid(y)


if __name__ == "__main__":
    key = jax.random.PRNGKey(0)

    # Small config, same structure as the module defaults (5 levels, scales 1..16).
    in_channels = [8, 16, 32, 64, 64]
    scale_factors = [1, 2, 4, 8, 16]
    base = 32
    N = 2

    # Feature shapes per layer, reversed so the list is deepest-first, which is the
    # ordering PredictionHead.forward expects (it does x[::-1]).
    feat_shapes = [(N, c, base // s, base // s)
                   for c, s in zip(in_channels, scale_factors)][::-1]

    keys = jax.random.split(key, len(feat_shapes) + 2 * len(in_channels))
    x_list = [jax.random.normal(keys[j], s, dtype=jnp.float32)
              for j, s in enumerate(feat_shapes)]

    # Conv2d(C, 1, 1) params: weight (1,C,1,1) flattened to (C,), bias (1,).
    params = []
    koff = len(feat_shapes)
    for i_layer, c in enumerate(in_channels):
        bound = 1.0 / np.sqrt(c)
        w = jax.random.uniform(keys[koff + 2 * i_layer], (c,), jnp.float32, -bound, bound)
        b = jax.random.uniform(keys[koff + 2 * i_layer + 1], (1,), jnp.float32, -bound, bound)
        params.append((w, b))

    outs = prediction_head(x_list, params, scale_factors)
    outs = jax.block_until_ready(outs)

    # Validate against pure-JAX reference (exercises flat, kron and separable paths).
    xs_rev = x_list[::-1]
    for i, ((w, b), s) in enumerate(zip(params, scale_factors)):
        ref = _reference_block(xs_rev[i], w, b, s)
        assert outs[i].shape == (N, 1, base, base), outs[i].shape
        np.testing.assert_allclose(np.asarray(outs[i]), np.asarray(ref),
                                   rtol=1e-5, atol=1e-5)

    print("KERNEL_OK")
</pallas_src>

<mosaic_0001>
module attributes {stable_mosaic.version = 11 : i64} {
  func.func @_conv_sigmoid_kernel(%arg0: i32, %arg1: i32, %arg2: memref<1x8xf32, #tpu.memory_space<vmem>>, %arg3: memref<1xf32, #tpu.memory_space<smem>>, %arg4: memref<1x8x512xf32, #tpu.memory_space<vmem>>, %arg5: memref<1x1x512xf32, #tpu.memory_space<vmem>>) attributes {dimension_semantics = [#tpu.dimension_semantics<parallel>, #tpu.dimension_semantics<parallel>], iteration_bounds = array<i64: 2, 2>, scalar_prefetch = 0 : i64, scratch_operands = 0 : i64, tpu.core_type = #tpu.core_type<tc>, window_params = [{pipeline_mode = #tpu.pipeline_mode<synchronous>, transform_indices = @transform_0, window_bounds = array<i64: 1, 8>}, {transform_indices = @transform_1, window_bounds = array<i64: 1>}, {transform_indices = @transform_2, window_bounds = array<i64: 1, 8, 512>}, {transform_indices = @transform_3, window_bounds = array<i64: 1, 1, 512>}]} {
    %c0 = arith.constant 0 : index
    %c0_0 = arith.constant 0 : index
    %0 = vector.load %arg2[%c0, %c0_0] : memref<1x8xf32, #tpu.memory_space<vmem>>, vector<1x8xf32>
    %c0_1 = arith.constant 0 : index
    %c0_2 = arith.constant 0 : index
    %c0_3 = arith.constant 0 : index
    %1 = vector.load %arg4[%c0_1, %c0_2, %c0_3] : memref<1x8x512xf32, #tpu.memory_space<vmem>>, vector<1x8x512xf32>
    %2 = vector.shape_cast %1 : vector<1x8x512xf32> to vector<8x512xf32>
    %cst = arith.constant dense<0.000000e+00> : vector<1x512xf32>
    %3 = tpu.matmul %0, %2, %cst {dimension_numbers = #tpu.dot_dimension_numbers<[1], [0], [0], [1], [0, 0, 1, 1], [], []>} : vector<1x8xf32>, vector<8x512xf32>, vector<1x512xf32> -> vector<1x512xf32>
    %c0_4 = arith.constant 0 : index
    %4 = memref.load %arg3[%c0_4] : memref<1xf32, #tpu.memory_space<smem>>
    %5 = vector.broadcast %4 : f32 to vector<1x512xf32>
    %6 = arith.addf %3, %5 : vector<1x512xf32>
    %7 = arith.negf %6 : vector<1x512xf32>
    %8 = math.exp %7 : vector<1x512xf32>
    %cst_5 = arith.constant 1.000000e+00 : f32
    %9 = vector.broadcast %cst_5 : f32 to vector<1x512xf32>
    %10 = arith.addf %9, %8 : vector<1x512xf32>
    %11 = arith.divf %9, %10 : vector<1x512xf32>
    %c0_6 = arith.constant 0 : index
    %c0_7 = arith.constant 0 : index
    %c0_8 = arith.constant 0 : index
    %12 = vector.load %arg5[%c0_6, %c0_7, %c0_8] : memref<1x1x512xf32, #tpu.memory_space<vmem>>, vector<1x1x512xf32>
    %13 = vector.shape_cast %12 : vector<1x1x512xf32> to vector<1x512xf32>
    %14 = vector.shape_cast %11 : vector<1x512xf32> to vector<1x1x512xf32>
    tpu.vector_store %arg5[%c0_6, %c0_7, %c0_8], %14 {strides = array<i32>} : memref<1x1x512xf32, #tpu.memory_space<vmem>>, vector<1x1x512xf32>,
    return
  }
  func.func @transform_0(%arg0: i32, %arg1: i32) -> (i32, i32) {
    %c0_i32 = arith.constant 0 : i32
    %c0_i32_0 = arith.constant 0 : i32
    %c0_i32_1 = arith.constant 0 : i32
    return %c0_i32, %c0_i32_0 : i32, i32
  }
  func.func @transform_1(%arg0: i32, %arg1: i32) -> i32 {
    %c0_i32 = arith.constant 0 : i32
    %c0_i32_0 = arith.constant 0 : i32
    return %c0_i32 : i32
  }
  func.func @transform_2(%arg0: i32, %arg1: i32) -> (i32, i32, i32) {
    %c0_i32 = arith.constant 0 : i32
    %c0_i32_0 = arith.constant 0 : i32
    return %arg1, %c0_i32, %arg0 : i32, i32, i32
  }
  func.func @transform_3(%arg0: i32, %arg1: i32) -> (i32, i32, i32) {
    %c0_i32 = arith.constant 0 : i32
    %c0_i32_0 = arith.constant 0 : i32
    return %arg1, %c0_i32, %arg0 : i32, i32, i32
  }
}

</mosaic_0001>

<bundles_post_ra>
// kernel: tpu_custom_call.1
= control target key start
LH: loop header
LB: loop body
LE: loop exit
PB: predicated region body
PF: predicated region fallthrough
CT: control target
= control target key end

     0   :  { %s955_s0 = inlined_call_operand.vmem [shape: f32[1,8], index: 0, kind: input, shape index: {}]   ;;  %s956_s1 = inlined_call_operand.<no memory space> [shape: f32[1], index: 1, kind: input, shape index: {}]   ;;  %s957_s2 = inlined_call_operand.hbm [shape: f32[2,8,1024], index: 2, kind: input, shape index: {}]   ;;  %s958_s3 = inlined_call_operand.hbm [shape: f32[2,1,1024], index: 3, kind: output, shape index: {}]  }
   0x1   :  { %8 = sst [smem:[#allocation2]] %s956_s1 }
   0x2   :  { %9 = vsyncpa [#allocation4], 0 }
   0x3   :  { %11 = vsyncpa [#allocation4 + $0x1], 0 }
   0x4   :  { %12 = vsyncpa [#allocation5], 0 }
   0x5   :  { %14 = vsyncpa [#allocation5 + $0x1], 0  ;;  %s795_s14 = smov 0   ;;  %s797_s15 = smov 0  }
   0x6   :  { %s799_s16 = smov 0   ;;  %s801_s17 = smov 0  }
   0x7   :  { %s803_s18 = smov 0   ;;  %s805_s19 = smov 0  }
   0x8   :  { %s807_s20 = smov 0   ;;  %s809_s21 = smov 0  }
   0x9 LB: > { %s523_s1 = sadd.s32 4294967295, %s766_s21   ;;  %s524_s22 = sadd.s32 4294967294, %s766_s21   ;;  %s766_s21 = sphi %s809_s21, %s20_s21   ;;  %s762_s20 = sphi %s807_s20, %s971_s20   ;;  %s758_s19 = sphi %s805_s19, %s970_s19   ;;  %s754_s18 = sphi %s803_s18, %s969_s18   ;;  %s750_s17 = sphi %s801_s17, %s968_s17   ;;  %s746_s16 = sphi %s799_s16, %s967_s16   ;;  %s742_s15 = sphi %s797_s15, %s966_s15   ;;  %s738_s14 = sphi %s795_s14, %s965_s14  }
   0xa   : > { %s29_s23 = sadd.s32 1, %s758_s19  ;;  %s32_s24 = sadd.s32 1, %s762_s20 }
   0xb   : > { %p30_p0 = scmp.ge.s32.totalorder %s29_s23, 2  ;;  %s83_s25 = sadd.s32 1, %s746_s16 }
   0xc   : > { %p90_p1 = scmp.ne.s32.totalorder %s746_s16, %s742_s15  ;;  %p91_p2 = scmp.eq.s32.totalorder %s766_s21, 0 }
   0xd   : > { %s973_s23 = smov (%p30_p0, %s29_s23), 0  ;;  %s975_s24 = smov (!%p30_p0, %s32_s24), %s762_s20 }
   0xe   : > { %s78_s26 = ssub.s32 %s758_s19, %s973_s23  ;;  %p848_p3 = por %p91_p2, %p90_p1 }
   0xf   : > { %p34_p4 = scmp.ge.s32.totalorder %s975_s24, 2  ;;  %p96_p5 = scmp.ne.s32.totalorder %s742_s15, %s738_s14 }
  0x10   : > { %p97_p6 = scmp.eq.s32.totalorder %s523_s1, 0  ;;  %p122_p7 = scmp.eq.s32.totalorder %s523_s1, 3 }
  0x11   : > { %s977_s24 = smov (%p34_p4, %s975_s24), 0  ;;  %p128_p10 = scmp.eq.s32.totalorder %s524_s22, 3 }
  0x12   : > { %p856_p8 = por %p97_p6, %p96_p5  ;;  %p860_p9 = por %p122_p7, %p90_p1 }
  0x13   : > { %s79_s30 = ssub.s32 %s762_s20, %s977_s24  ;;  %p866_p12 = por %p128_p10, %p96_p5 }
  0x14   : > { %s80_s4 = sor.u32 %s79_s30, %s78_s26  ;;  %p558_p13 = scmp.lt.s32.totalorder %s766_s21, 4 }
  0x15   : > { %p81_p11 = scmp.eq.s32.totalorder %s80_s4, 0  ;;  %s154_s6 = sand.u32 1, %s746_s16  }
  0x16   : > { %s962_s5 = scalar_select %p866_p12, 1, 0 }
  0x17   : > { %s873_s7 = scalar_select %p81_p11, %s746_s16, %s83_s25  }
  0x18   : > { %s527_s8 = sshll.u32 %s154_s6, 5  ;;  %s528_s9 = sshll.u32 %s762_s20, 2 }
  0x19   : > { %s529_s10 = sshll.u32 %s758_s19, 3  ;;  %s158_s11 = scalar_lea.vmem [#allocation3], %s527_s8 }
  0x1a   : > { %s168_s12 = sshll.u32 %s158_s11, 4  ;;  %s164_s13 = sadd.s32 %s529_s10, %s528_s9  ;;  %s169_s12 = int_to_ptr.vmem [resolvable:$true] %s168_s12 }
  0x1b   : > { %s530_s1 = sshll.u32 %s164_s13, 7  ;;  %p879_p0 = pnand %p558_p13, %p848_p3 }
  0x1c   : > { %s166_s4 = scalar_lea.hbm %s957_s2, %s530_s1  ;;  %p531_p1 = scmp.ge.s32.totalorder %s766_s21, 1 }
  0x1d   : > { %p173_p2 = scmp.lt.s32.totalorder %s766_s21, 5  ;;  %s155_s25 = scalar_lea.sflag [#allocation4], %s154_s6 }
  0x1e   : > { %p644_p4 = pneg %p879_p0  ;;  %s655_s8 = scalar_lea.vmem %s169_s12, 512 }
  0x1f   : > { %p656_p5 = scmp.ne.s32.totalorder %s169_s12, %s655_s8  ;;  %s768_s9 = smov [#allocation3]  }
  0x20   : > { %s660_s27 = sshll.u32 %s768_s9, 4  ;;  %s661_s27 = int_to_ptr.vmem [resolvable:$false] %s660_s27 }
  0x21   : > { %p658_p6 = pnand %p656_p5, %p644_p4  ;;  %s662_s10 = scalar_lea.vmem %s661_s27, 1024 }
  0x22   : > { %p663_p3 = scmp.lt.s32.totalorder %s169_s12, %s661_s27  ;;  %p664_p10 = scmp.lt.s32.totalorder %s662_s10, %s655_s8 }
  0x23   : > { %p659_p7 = pneg %p658_p6 }
  0x24   : > { %p665_p11 = por %p664_p10, %p663_p3 }
  0x26   : > { %p666_p13 = pnand %p665_p11, %p659_p7 }
  0x28   : > { %669 = shalt.err (!%p666_p13)
}
  0x29   : > { %553 = dma.hbm_to_vmem [thread:$0]  (!%p879_p0), %s166_s4, 512, %s169_s12, %s155_s25  }
  0x2a   : > { %p174_p12 = pnand %p531_p1, %p173_p2 }
  0x2b   : > { %s897_s6 = sand.u32 (!%p174_p12), 1, %s742_s15  }
  0x2c   : > { %177 = sbr.rel (%p174_p12) target bundleno = 305 (0x131), region = 32  ;;  %s532_s11 = sshll.u32 (!%p174_p12), %s897_s6, 5 }
  0x2d   : > { %s180_s13 = scalar_lea.sflag (!%p174_p12), [#allocation4], %s897_s6  ;;  %s183_s1 = scalar_lea.vmem (!%p174_p12), [#allocation3], %s532_s11 }
  0x31   : > { %729 = dma.done.wait (%p856_p8), %s180_s13, 512  }
  0x32   : > { %731 = vsyncadd (%p856_p8), %s180_s13, 4294966784  ;;  %v769_v0 = vmov 0.0   ;;  %v210_v1 = vld [vmem:[%s183_s1 + $0x8] sm:$0xff]  ;;  %v212_v2 = vld [vmem:[%s183_s1 + $0x18] sm:$0xff]  ;;  %vm215_vm0 = vcmask 64512   ;;  %s213_s28 = sld [smem:[#allocation2]]  ;;  %v394_v29 = vlaneseq }
  0x33   : > { %283 = vmatprep.mubr.f32.mxu0 %v769_v0  ;;  %354 = vmatprep.mubr.f32.mxu1 %v769_v0  ;;  %v209_v3 = vld [vmem:[%s183_s1] sm:$0xff]  ;;  %v211_v4 = vld [vmem:[%s183_s1 + $0x10] sm:$0xff]  ;;  %v770_v27 = vmov 1966171168   ;;  %s533_s26 = sshll.u32 %s897_s6, 2  ;;  %s541_s30 = sshll.u32 %s754_s18, 2 }
  0x34   : > { %249 = vmatprep.subr.mxu0 %v210_v1  ;;  %320 = vmatprep.subr.mxu1 %v212_v2  ;;  %v208_v5 = vld [vmem:[%s955_s0] sm:$0x1]  ;;  %v392_v28 = vunpack.c.l.s4 %v770_v27  ;;  %v395_v31 = vshrl.u32 %v394_v29, 7  ;;  %s542_s4 = sshll.u32 %s750_s17, 3  ;;  %s205_s9 = scalar_lea.vmem [#allocation6], %s533_s26  ;;  %vm416_vm1 = vcmp.lt.s32.totalorder %v394_v29, 512 }
  0x35   : > { %250 = vmatpush1.msra.mxu0 %v209_v3  ;;  %321 = vmatpush1.msra.mxu1 %v211_v4  ;;  %s432_s25 = sadd.s32 %s542_s4, %s541_s30  ;;  %s436_s27 = sshll.u32 %s205_s9, 4  ;;  %s437_s27 = int_to_ptr.vmem [resolvable:$true] %s436_s27 }
  0x36   : > { %534 = vmatmul.mubr.msk.f32.vlgmr.msra.gmra.mxu0 %vm215_vm0, %v208_v5  ;;  %535 = vmatmul.mubr.msk.f32.vlgmr.msra.gmra.mxu1 %vm215_vm0, %v208_v5  ;;  %v393_v30 = vunpack.c.0.s8 %v392_v28  ;;  %s543_s8 = sshll.u32 %s432_s25, 4  ;;  %s420_s17 = scalar_lea.sflag [#allocation5], %s897_s6 }
  0x37   : > { %s434_s18 = scalar_lea.hbm %s958_s3, %s543_s8  ;;  %s670_s13 = scalar_lea.vmem %s437_s27, 64 }
  0x38   : > { %v214_v6 = vstv %s213_s28  ;;  %v396_v34 = vsub.s32 %v393_v30, %v395_v31  ;;  %p671_p8 = scmp.ne.s32.totalorder %s437_s27, %s670_s13  ;;  %s771_s1 = smov [#allocation6]  }
  0x39   : > { %s674_s12 = sshll.u32 %s771_s1, 4  ;;  %s675_s12 = int_to_ptr.vmem [resolvable:$false] %s674_s12 }
  0x3a   : > { %p672_p12 = pnand %p671_p8, %p860_p9  ;;  %s676_s22 = scalar_lea.vmem %s675_s12, 128 }
  0x3b   : > { %p677_p1 = scmp.lt.s32.totalorder %s437_s27, %s675_s12  ;;  %p678_p2 = scmp.lt.s32.totalorder %s676_s22, %s670_s13 }
  0x3c   : > { %p673_p0 = pneg %p672_p12 }
  0x3d   : > { %p679_p4 = por %p678_p2, %p677_p1 }
  0x3f   : > { %p680_p5 = pnand %p679_p4, %p673_p0 }
  0xf6   : > { %v285_v7 = vpop.f32.mrf.mxu0  ;;  %v356_v8 = vpop.f32.mrf.mxu1 }
  0xf7   : > { %v286_v9 = vadd.f32 %v285_v7, %v214_v6  ;;  %v357_v10 = vadd.f32 %v356_v8, %v214_v6 }
  0xf8   : > { %v287_v11 = vpop.f32.mrf.mxu0  ;;  %v358_v12 = vpop.f32.mrf.mxu1 }
  0xf9   : > { %v536_v13 = vmul.f32 -1.442695, %v286_v9  ;;  %v538_v14 = vmul.f32 -1.442695, %v357_v10  ;;  %v288_v15 = vadd.f32 %v287_v11, %v214_v6  ;;  %v359_v16 = vadd.f32 %v358_v12, %v214_v6 }
  0xfb   : > { %626 = vpow2.f32 %v536_v13  ;;  %v537_v17 = vmul.f32 -1.442695, %v288_v15  ;;  %v539_v18 = vmul.f32 -1.442695, %v359_v16 }
  0xfc   : > { %628 = vpow2.f32 %v538_v14 }
  0xfd   : > { %630 = vpow2.f32 %v537_v17 }
  0xfe   : > { %632 = vpow2.f32 %v539_v18 }
 0x108   : > { %v627_v19 = vpop.eup %626 }
 0x109   : > { %v629_v20 = vpop.eup %628  ;;  %v373_v21 = vadd.f32 1.0, %v627_v19 }
 0x10a   : > { %v631_v22 = vpop.eup %630  ;;  %v375_v23 = vadd.f32 1.0, %v629_v20 }
 0x10b   : > { %v633_v24 = vpop.eup %632  ;;  %634 = vrcp.f32 %v373_v21  ;;  %v374_v25 = vadd.f32 1.0, %v631_v22 }
 0x10c   : > { %636 = vrcp.f32 %v375_v23  ;;  %v376_v26 = vadd.f32 1.0, %v633_v24 }
 0x10d   : > { %638 = vrcp.f32 %v374_v25 }
 0x10e   : > { %640 = vrcp.f32 %v376_v26 }
 0x118   : > { %v635_v32 = vpop.eup %634 }
 0x119   : > { %v637_v33 = vpop.eup %636 }
 0x11a   : > { %v639_v35 = vpop.eup %638 }
 0x11b   : > { %v641_v36 = vpop.eup %640  ;;  %v389_v37 = vcombine.low %v635_v32, %v639_v35 }
 0x11c   : > { %v390_v38 = vcombine.low %v637_v33, %v641_v36 }
 0x11d   : > { %v397_v39 = vrot.slane %v389_v37, %v396_v34 }
 0x11e   : > { %v404_v40 = vrot.slane %v390_v38, %v396_v34 }
 0x120   : > { %v405_v41 = vcombine.low %v397_v39, %v404_v40 }
 0x122   : > { %v412_v42 = vrot.slane %v405_v41, %v396_v34 }
 0x124   : > { %418 = vst.msk [vmem:[%s205_s9] sm:$0xf] %vm416_vm1, %v412_v42 }
 0x125   : > { %683 = shalt.err (!%p680_p5)
}
 0x126   : > { %s684_s28 = scalar_lea.hbm %s434_s18, 64  ;;  %s688_s30 = scalar_lea.hbm %s958_s3, 256 }
 0x127   : > { %p685_p6 = scmp.ne.s32.totalorder %s434_s18, %s684_s28  ;;  %p689_p10 = scmp.lt.s32.totalorder %s434_s18, %s958_s3 }
 0x128   : > { %p690_p11 = scmp.lt.s32.totalorder %s688_s30, %s684_s28 }
 0x129   : > { %p686_p7 = pnand %p685_p6, %p860_p9 }
 0x12a   : > { %p691_p13 = por %p690_p11, %p689_p10 }
 0x12b   : > { %p687_p3 = pneg %p686_p7 }
 0x12d   : > { %p692_p8 = pnand %p691_p13, %p687_p3 }
 0x12f   : > { %695 = shalt.err (!%p692_p8)
}
 0x130   : > { %548 = dma.vmem_to_hbm [thread:$0]  (%p860_p9), %s437_s27, 64, %s434_s18, %s420_s17  }
 0x131 PF: > { %p559_p12 = scmp.ge.s32.totalorder %s766_s21, 2  ;;  %s448_s8 = sand.u32 1, %s738_s14  }
 0x132   : > { %p964_p0 = scmp.ne.s32.totalorder %s962_s5, 0  ;;  %s449_s9 = scalar_lea.sflag [#allocation5], %s448_s8 }
 0x134   : > { %p555_p1 = pnand %p559_p12, %p964_p0 }
 0x136   : > { %p556_p2 = pneg %p555_p1 }
 0x138   : > { %733 = dma.done.wait (%p556_p2), %s449_s9, 64  }
 0x139   : > { %735 = vsyncadd (%p556_p2), %s449_s9, 4294967232  ;;  %s20_s21 = sadd.s32 1, %s766_s21   ;;  %s965_s14 = smov %s742_s15 }
 0x13a   : > { %p17_p4 = scmp.ge.s32.totalorder %s20_s21, 6   ;;  %s966_s15 = smov %s746_s16 }
 0x13b   : > { %s967_s16 = smov %s873_s7  ;;  %s968_s17 = smov %s758_s19 }
 0x13c   : > { %s969_s18 = smov %s762_s20  ;;  %s970_s19 = smov %s973_s23 }
 0x13d   : > { %s971_s20 = smov %s977_s24  ;;  %19 = sbr.rel (!%p17_p4) target bundleno = 9 (0x9), region = 77 }
 0x142   :  { %454 = vsyncpa [#allocation4], 1 }
 0x143   :  { %456 = vsyncpa [#allocation4 + $0x1], 1 }
 0x144   :  { %457 = vsyncpa [#allocation5], 1 }
 0x145   :  { %459 = vsyncpa [#allocation5 + $0x1], 1 }

</bundles_post_ra>
